<compile_context>
chip_gen: v6e
topology: v6e:2x2x1
jax: 0.10.0
libtpu: 0.0.40
codegen_flags: <defaults>
</compile_context>

<pallas_src>
import jax
import jax.numpy as jnp
import numpy as np
from jax import lax
from jax.experimental import pallas as pl
from jax.experimental.pallas import tpu as pltpu


def _round_up(x, m):
    return ((x + m - 1) // m) * m


# ----------------------------------------------------------------------------
# Fused whole-network kernel (one batch element per grid step).
# ----------------------------------------------------------------------------
def make_tcn_kernel(layer_plan, kernel_size, T_pad, compute_dtype):
    k = kernel_size
    num_layers = len(layer_plan)

    def kernel(*refs):
        it = iter(refs)
        x_ref = next(it)                      # (c_in0, T_pad)   compute_dtype
        layer_refs = []
        for lp in layer_plan:
            w1 = next(it); b1 = next(it); w2 = next(it); b2 = next(it)
            if lp["has_downsample"]:
                wd = next(it); bd = next(it)
            else:
                wd = bd = None
            layer_refs.append((w1, b1, w2, b2, wd, bd))
        o_ref = next(it)                      # (c_last, T_pad)  float32
        a_ref = next(it)                      # (c_max, T_pad)   compute_dtype (layer input)
        s_ref = next(it)                      # (k*c_max, T_pad) compute_dtype (tap slab)

        def fused_causal_conv(get_src, c_in, w_ref, b_ref, dil):
            """Dilated causal conv folded into ONE MXU matmul.

            get_src(n) -> first n time columns of the conv input, (c_in, n).
            Tap j is the input delayed by shift=(k-1-j)*dil, i.e. slab row
            block j = [zeros(shift) | input[:, :T_pad-shift]].
            """
            for j in range(k):
                shift = (k - 1 - j) * dil
                blk = slice(j * c_in, (j + 1) * c_in)
                if shift > 0:
                    s_ref[blk, :shift] = jnp.zeros((c_in, shift), compute_dtype)
                    s_ref[blk, shift:] = get_src(T_pad - shift)
                else:
                    s_ref[blk, :] = get_src(T_pad)
            acc = jnp.dot(w_ref[...], s_ref[:k * c_in, :],
                          preferred_element_type=jnp.float32)
            return jnp.maximum(acc + b_ref[...], 0.0)        # f32 (c_out, T_pad)

        for li in range(num_layers):
            lp = layer_plan[li]
            w1, b1, w2, b2, wd, bd = layer_refs[li]
            c_in, c_out, dil = lp["c_in"], lp["c_out"], lp["dilation"]

            if li == 0:
                def get_cur(n):
                    return x_ref[:, :n]
            else:
                def get_cur(n, _c=c_in):
                    return a_ref[:_c, :n]

            # conv1 -> chomp -> ReLU (dropout = identity)
            h1 = fused_causal_conv(get_cur, c_in, w1, b1, dil)
            h1_c = h1.astype(compute_dtype)

            def get_h1(n, _h=h1_c):
                return _h[:, :n]

            # conv2 -> chomp -> ReLU (dropout = identity)
            h2 = fused_causal_conv(get_h1, c_out, w2, b2, dil)

            # residual branch + final ReLU
            x_cur = get_cur(T_pad)
            if lp["has_downsample"]:
                res = jnp.dot(wd[...], x_cur,
                              preferred_element_type=jnp.float32) + bd[...]
            else:
                res = x_cur.astype(jnp.float32)
            out = jnp.maximum(h2 + res, 0.0)

            if li == num_layers - 1:
                o_ref[...] = out.astype(o_ref.dtype)         # lane-dense store
            else:
                a_ref[:c_out, :] = out.astype(compute_dtype)  # stays in VMEM

    return kernel


def tcn_forward(x, params, kernel_size, compute_dtype=jnp.float32):
    """x: (B, c_in, T) float32 -> (B, c_last, T) float32."""
    B, c_in0, T = x.shape
    k = kernel_size
    T_pad = _round_up(max(T, 128), 128)      # lane-dense time axis
    itemsize = np.dtype(compute_dtype).itemsize

    layer_plan = []
    c_prev = c_in0
    for i, p in enumerate(params):
        c_out = p["b1"].shape[0]
        layer_plan.append(dict(c_in=c_prev, c_out=c_out, dilation=2 ** i,
                               has_downsample="wd" in p))
        c_prev = c_out
    c_last = c_prev
    c_max = max([c_in0] + [lp["c_out"] for lp in layer_plan])

    # Single small right-pad of the *network input* only (causal convs never
    # read forward in time, so the pad cannot affect outputs at t < T).
    if T_pad != T:
        x = jnp.pad(x, ((0, 0), (0, 0), (0, T_pad - T)))
    x = x.astype(compute_dtype)

    inputs = [x]
    in_specs = [pl.BlockSpec((None, c_in0, T_pad), lambda b: (b, 0, 0))]
    flops = 0
    w_bytes = 0
    for lp, p in zip(layer_plan, params):
        c_in, c_out = lp["c_in"], lp["c_out"]
        layer_inputs = [p["w1f"].astype(compute_dtype), p["b1"],
                        p["w2f"].astype(compute_dtype), p["b2"]]
        if lp["has_downsample"]:
            layer_inputs += [p["wd"].astype(compute_dtype), p["bd"]]
        for w in layer_inputs:
            inputs.append(w)
            in_specs.append(pl.BlockSpec(w.shape, lambda b: (0, 0)))
            w_bytes += int(w.size) * w.dtype.itemsize
        flops += 2 * B * T_pad * k * c_in * c_out            # conv1
        flops += 2 * B * T_pad * k * c_out * c_out           # conv2
        if lp["has_downsample"]:
            flops += 2 * B * T_pad * c_in * c_out            # 1x1 downsample

    out_bytes = B * c_last * T_pad * 4
    bytes_accessed = int(x.size) * itemsize + out_bytes + w_bytes
    scratch_bytes = (c_max + k * c_max) * T_pad * itemsize
    vmem_need = (2 * c_in0 * T_pad * itemsize                # input block (2x buffered)
                 + 2 * c_last * T_pad * 4                    # output block (2x buffered)
                 + 2 * w_bytes                               # weights
                 + scratch_bytes)
    vmem_limit = int(min(max(2 * vmem_need, 16 * 2 ** 20), 64 * 2 ** 20))

    kernel = make_tcn_kernel(layer_plan, k, T_pad, compute_dtype)

    out = pl.pallas_call(
        kernel,
        out_shape=jax.ShapeDtypeStruct((B, c_last, T_pad), jnp.float32),
        grid_spec=pltpu.PrefetchScalarGridSpec(
            num_scalar_prefetch=0,
            grid=(B,),
            in_specs=in_specs,
            out_specs=pl.BlockSpec((None, c_last, T_pad), lambda b: (b, 0, 0)),
            scratch_shapes=[
                pltpu.VMEM((c_max, T_pad), compute_dtype),        # layer input
                pltpu.VMEM((k * c_max, T_pad), compute_dtype),    # folded-tap slab
            ],
        ),
        compiler_params=pltpu.CompilerParams(
            dimension_semantics=("parallel",),      # batch is independent (v7x: 2 TCs)
            vmem_limit_bytes=vmem_limit),
        cost_estimate=pl.CostEstimate(
            flops=int(flops), transcendentals=0,
            bytes_accessed=int(bytes_accessed)),
    )(*inputs)

    return out[:, :, :T]


# ----------------------------------------------------------------------------
# Parameter construction (deterministic, synthetic) + weight_norm folding.
# ----------------------------------------------------------------------------
def weight_norm_weight(v, g):
    # PyTorch weight_norm (dim=0): w[o] = g[o] * v[o] / ||v[o]||_F
    norm = jnp.sqrt(jnp.sum(v * v, axis=(1, 2), keepdims=True))
    return g[:, None, None] * v / norm


def init_tcn_params(key, num_inputs, num_channels, kernel_size):
    params = []
    for i, c_out in enumerate(num_channels):
        c_in = num_inputs if i == 0 else num_channels[i - 1]
        key, k1, k2, k3, k4, k5, k6, k7, k8 = jax.random.split(key, 9)
        v1 = 0.01 * jax.random.normal(k1, (c_out, c_in, kernel_size), jnp.float32)
        g1 = 1.0 + 0.1 * jax.random.normal(k2, (c_out,), jnp.float32)
        b1 = 0.05 * jax.random.normal(k3, (c_out,), jnp.float32)
        v2 = 0.01 * jax.random.normal(k4, (c_out, c_out, kernel_size), jnp.float32)
        g2 = 1.0 + 0.1 * jax.random.normal(k5, (c_out,), jnp.float32)
        b2 = 0.05 * jax.random.normal(k6, (c_out,), jnp.float32)
        w1 = weight_norm_weight(v1, g1)      # (c_out, c_in, k)  OIH
        w2 = weight_norm_weight(v2, g2)      # (c_out, c_out, k) OIH
        p = {
            # folded-tap layout (c_out, k*c_in): column block j holds tap j
            "w1f": jnp.transpose(w1, (0, 2, 1)).reshape(c_out, kernel_size * c_in),
            "b1": b1[:, None],
            "w2f": jnp.transpose(w2, (0, 2, 1)).reshape(c_out, kernel_size * c_out),
            "b2": b2[:, None],
            # OIH copies used only by the pure-JAX reference
            "w1_oih": w1,
            "w2_oih": w2,
        }
        if c_in != c_out:                    # 1x1 downsample conv (with bias)
            wd = 0.01 * jax.random.normal(k7, (c_out, c_in), jnp.float32)
            bd = 0.05 * jax.random.normal(k8, (c_out,), jnp.float32)
            p["wd"] = wd
            p["bd"] = bd[:, None]
        params.append(p)
    return params


# ----------------------------------------------------------------------------
# Pure-JAX reference (independent path via lax.conv_general_dilated).
# ----------------------------------------------------------------------------
def _causal_conv1d_ref(x, w_oih, b, dilation):
    pad = (w_oih.shape[-1] - 1) * dilation
    y = lax.conv_general_dilated(
        x, w_oih, window_strides=(1,), padding=[(pad, 0)],
        rhs_dilation=(dilation,),
        dimension_numbers=("NCH", "OIH", "NCH"))
    return y + b[None, :, None]


def tcn_forward_ref(x, params, kernel_size):
    h = x
    for i, p in enumerate(params):
        d = 2 ** i
        out = jnp.maximum(_causal_conv1d_ref(h, p["w1_oih"], p["b1"][:, 0], d), 0.0)
        out = jnp.maximum(_causal_conv1d_ref(out, p["w2_oih"], p["b2"][:, 0], d), 0.0)
        if "wd" in p:
            res = jnp.einsum("oc,bct->bot", p["wd"], h) + p["bd"][None, :, :]
        else:
            res = h
        h = jnp.maximum(out + res, 0.0)
    return h


# ----------------------------------------------------------------------------
if __name__ == "__main__":
    key = jax.random.PRNGKey(0)
    B, C_in, T = 2, 4, 16
    num_channels = [8, 8]          # layer0 has a 1x1 downsample, layer1 does not
    kernel_size = 2

    k_params, k_x = jax.random.split(key)
    params = init_tcn_params(k_params, C_in, num_channels, kernel_size)
    x = jax.random.normal(k_x, (B, C_in, T), jnp.float32)

    # Demo uses f32 compute; set compute_dtype=jnp.bfloat16 for production MXU
    # throughput (f32 accumulation is kept either way — loosen atol if used).
    out = tcn_forward(x, params, kernel_size, compute_dtype=jnp.float32)
    out = jax.block_until_ready(out)

    ref = tcn_forward_ref(x, params, kernel_size)
    assert out.shape == (B, num_channels[-1], T), out.shape
    assert jnp.allclose(out, ref, atol=1e-4, rtol=1e-4), (
        float(jnp.max(jnp.abs(out - ref))))

    print("KERNEL_OK")
</pallas_src>

<mosaic_0001>
module attributes {stable_mosaic.version = 11 : i64} {
  func.func @kernel(%arg0: i32, %arg1: memref<1x4x128xf32, #tpu.memory_space<vmem>>, %arg2: memref<8x8xf32, #tpu.memory_space<vmem>>, %arg3: memref<8x1xf32, #tpu.memory_space<vmem>>, %arg4: memref<8x16xf32, #tpu.memory_space<vmem>>, %arg5: memref<8x1xf32, #tpu.memory_space<vmem>>, %arg6: memref<8x4xf32, #tpu.memory_space<vmem>>, %arg7: memref<8x1xf32, #tpu.memory_space<vmem>>, %arg8: memref<8x16xf32, #tpu.memory_space<vmem>>, %arg9: memref<8x1xf32, #tpu.memory_space<vmem>>, %arg10: memref<8x16xf32, #tpu.memory_space<vmem>>, %arg11: memref<8x1xf32, #tpu.memory_space<vmem>>, %arg12: memref<1x8x128xf32, #tpu.memory_space<vmem>>, %arg13: memref<8x128xf32, #tpu.memory_space<vmem>>, %arg14: memref<16x128xf32, #tpu.memory_space<vmem>>) attributes {dimension_semantics = [#tpu.dimension_semantics<parallel>], iteration_bounds = array<i64: 2>, scalar_prefetch = 0 : i64, scratch_operands = 2 : i64, tpu.core_type = #tpu.core_type<tc>, window_params = [{transform_indices = @transform_0, window_bounds = array<i64: 1, 4, 128>}, {pipeline_mode = #tpu.pipeline_mode<synchronous>, transform_indices = @transform_1, window_bounds = array<i64: 8, 8>}, {pipeline_mode = #tpu.pipeline_mode<synchronous>, transform_indices = @transform_2, window_bounds = array<i64: 8, 1>}, {pipeline_mode = #tpu.pipeline_mode<synchronous>, transform_indices = @transform_3, window_bounds = array<i64: 8, 16>}, {pipeline_mode = #tpu.pipeline_mode<synchronous>, transform_indices = @transform_4, window_bounds = array<i64: 8, 1>}, {pipeline_mode = #tpu.pipeline_mode<synchronous>, transform_indices = @transform_5, window_bounds = array<i64: 8, 4>}, {pipeline_mode = #tpu.pipeline_mode<synchronous>, transform_indices = @transform_6, window_bounds = array<i64: 8, 1>}, {pipeline_mode = #tpu.pipeline_mode<synchronous>, transform_indices = @transform_7, window_bounds = array<i64: 8, 16>}, {pipeline_mode = #tpu.pipeline_mode<synchronous>, transform_indices = @transform_8, window_bounds = array<i64: 8, 1>}, {pipeline_mode = #tpu.pipeline_mode<synchronous>, transform_indices = @transform_9, window_bounds = array<i64: 8, 16>}, {pipeline_mode = #tpu.pipeline_mode<synchronous>, transform_indices = @transform_10, window_bounds = array<i64: 8, 1>}, {transform_indices = @transform_11, window_bounds = array<i64: 1, 8, 128>}]} {
    %cst = arith.constant 0.000000e+00 : f32
    %0 = vector.broadcast %cst : f32 to vector<4x1xf32>
    %c0 = arith.constant 0 : index
    %c0_0 = arith.constant 0 : index
    %1 = vector.load %arg14[%c0, %c0_0] : memref<16x128xf32, #tpu.memory_space<vmem>>, vector<4x1xf32>
    tpu.vector_store %arg14[%c0, %c0_0], %0 {strides = array<i32>} : memref<16x128xf32, #tpu.memory_space<vmem>>, vector<4x1xf32>,
    %c0_1 = arith.constant 0 : index
    %c0_2 = arith.constant 0 : index
    %c0_3 = arith.constant 0 : index
    %2 = vector.load %arg1[%c0_1, %c0_2, %c0_3] : memref<1x4x128xf32, #tpu.memory_space<vmem>>, vector<1x4x127xf32>
    %3 = vector.shape_cast %2 : vector<1x4x127xf32> to vector<4x127xf32>
    %c0_4 = arith.constant 0 : index
    %c1 = arith.constant 1 : index
    %4 = vector.load %arg14[%c0_4, %c1] : memref<16x128xf32, #tpu.memory_space<vmem>>, vector<4x127xf32>
    tpu.vector_store %arg14[%c0_4, %c1], %3 {strides = array<i32>} : memref<16x128xf32, #tpu.memory_space<vmem>>, vector<4x127xf32>,
    %c0_5 = arith.constant 0 : index
    %c0_6 = arith.constant 0 : index
    %c0_7 = arith.constant 0 : index
    %5 = vector.load %arg1[%c0_5, %c0_6, %c0_7] : memref<1x4x128xf32, #tpu.memory_space<vmem>>, vector<1x4x128xf32>
    %6 = vector.shape_cast %5 : vector<1x4x128xf32> to vector<4x128xf32>
    %c4 = arith.constant 4 : index
    %c0_8 = arith.constant 0 : index
    %7 = vector.load %arg14[%c4, %c0_8] : memref<16x128xf32, #tpu.memory_space<vmem>>, vector<4x128xf32>
    tpu.vector_store %arg14[%c4, %c0_8], %6 {strides = array<i32>} : memref<16x128xf32, #tpu.memory_space<vmem>>, vector<4x128xf32>,
    %c0_9 = arith.constant 0 : index
    %c0_10 = arith.constant 0 : index
    %8 = vector.load %arg2[%c0_9, %c0_10] : memref<8x8xf32, #tpu.memory_space<vmem>>, vector<8x8xf32>
    %c0_11 = arith.constant 0 : index
    %c0_12 = arith.constant 0 : index
    %9 = vector.load %arg14[%c0_11, %c0_12] : memref<16x128xf32, #tpu.memory_space<vmem>>, vector<8x128xf32>
    %cst_13 = arith.constant dense<0.000000e+00> : vector<8x128xf32>
    %10 = tpu.matmul %8, %9, %cst_13 {dimension_numbers = #tpu.dot_dimension_numbers<[1], [0], [0], [1], [0, 0, 1, 1], [], []>} : vector<8x8xf32>, vector<8x128xf32>, vector<8x128xf32> -> vector<8x128xf32>
    %c0_14 = arith.constant 0 : index
    %c0_15 = arith.constant 0 : index
    %11 = vector.load %arg3[%c0_14, %c0_15] : memref<8x1xf32, #tpu.memory_space<vmem>>, vector<8x1xf32>
    %12 = vector.broadcast %11 : vector<8x1xf32> to vector<8x128xf32>
    %13 = arith.addf %10, %12 : vector<8x128xf32>
    %cst_16 = arith.constant 0.000000e+00 : f32
    %14 = vector.broadcast %cst_16 : f32 to vector<8x128xf32>
    %15 = arith.maximumf %13, %14 : vector<8x128xf32>
    %cst_17 = arith.constant 0.000000e+00 : f32
    %16 = vector.broadcast %cst_17 : f32 to vector<8x1xf32>
    %c0_18 = arith.constant 0 : index
    %c0_19 = arith.constant 0 : index
    %17 = vector.load %arg14[%c0_18, %c0_19] : memref<16x128xf32, #tpu.memory_space<vmem>>, vector<8x1xf32>
    tpu.vector_store %arg14[%c0_18, %c0_19], %16 {strides = array<i32>} : memref<16x128xf32, #tpu.memory_space<vmem>>, vector<8x1xf32>,
    %18 = vector.extract_strided_slice %15 {offsets = [0, 0], sizes = [8, 127], strides = [1, 1]} : vector<8x128xf32> to vector<8x127xf32>
    %c0_20 = arith.constant 0 : index
    %c1_21 = arith.constant 1 : index
    %19 = vector.load %arg14[%c0_20, %c1_21] : memref<16x128xf32, #tpu.memory_space<vmem>>, vector<8x127xf32>
    tpu.vector_store %arg14[%c0_20, %c1_21], %18 {strides = array<i32>} : memref<16x128xf32, #tpu.memory_space<vmem>>, vector<8x127xf32>,
    %c8 = arith.constant 8 : index
    %c0_22 = arith.constant 0 : index
    %20 = vector.load %arg14[%c8, %c0_22] : memref<16x128xf32, #tpu.memory_space<vmem>>, vector<8x128xf32>
    tpu.vector_store %arg14[%c8, %c0_22], %15 {strides = array<i32>} : memref<16x128xf32, #tpu.memory_space<vmem>>, vector<8x128xf32>,
    %c0_23 = arith.constant 0 : index
    %c0_24 = arith.constant 0 : index
    %21 = vector.load %arg4[%c0_23, %c0_24] : memref<8x16xf32, #tpu.memory_space<vmem>>, vector<8x16xf32>
    %c0_25 = arith.constant 0 : index
    %c0_26 = arith.constant 0 : index
    %22 = vector.load %arg14[%c0_25, %c0_26] : memref<16x128xf32, #tpu.memory_space<vmem>>, vector<16x128xf32>
    %cst_27 = arith.constant dense<0.000000e+00> : vector<8x128xf32>
    %23 = tpu.matmul %21, %22, %cst_27 {dimension_numbers = #tpu.dot_dimension_numbers<[1], [0], [0], [1], [0, 0, 1, 1], [], []>} : vector<8x16xf32>, vector<16x128xf32>, vector<8x128xf32> -> vector<8x128xf32>
    %c0_28 = arith.constant 0 : index
    %c0_29 = arith.constant 0 : index
    %24 = vector.load %arg5[%c0_28, %c0_29] : memref<8x1xf32, #tpu.memory_space<vmem>>, vector<8x1xf32>
    %25 = vector.broadcast %24 : vector<8x1xf32> to vector<8x128xf32>
    %26 = arith.addf %23, %25 : vector<8x128xf32>
    %cst_30 = arith.constant 0.000000e+00 : f32
    %27 = vector.broadcast %cst_30 : f32 to vector<8x128xf32>
    %28 = arith.maximumf %26, %27 : vector<8x128xf32>
    %c0_31 = arith.constant 0 : index
    %c0_32 = arith.constant 0 : index
    %c0_33 = arith.constant 0 : index
    %29 = vector.load %arg1[%c0_31, %c0_32, %c0_33] : memref<1x4x128xf32, #tpu.memory_space<vmem>>, vector<1x4x128xf32>
    %30 = vector.shape_cast %29 : vector<1x4x128xf32> to vector<4x128xf32>
    %c0_34 = arith.constant 0 : index
    %c0_35 = arith.constant 0 : index
    %31 = vector.load %arg6[%c0_34, %c0_35] : memref<8x4xf32, #tpu.memory_space<vmem>>, vector<8x4xf32>
    %cst_36 = arith.constant dense<0.000000e+00> : vector<8x128xf32>
    %32 = tpu.matmul %31, %30, %cst_36 {dimension_numbers = #tpu.dot_dimension_numbers<[1], [0], [0], [1], [0, 0, 1, 1], [], []>} : vector<8x4xf32>, vector<4x128xf32>, vector<8x128xf32> -> vector<8x128xf32>
    %c0_37 = arith.constant 0 : index
    %c0_38 = arith.constant 0 : index
    %33 = vector.load %arg7[%c0_37, %c0_38] : memref<8x1xf32, #tpu.memory_space<vmem>>, vector<8x1xf32>
    %34 = vector.broadcast %33 : vector<8x1xf32> to vector<8x128xf32>
    %35 = arith.addf %32, %34 : vector<8x128xf32>
    %36 = arith.addf %28, %35 : vector<8x128xf32>
    %cst_39 = arith.constant 0.000000e+00 : f32
    %37 = vector.broadcast %cst_39 : f32 to vector<8x128xf32>
    %38 = arith.maximumf %36, %37 : vector<8x128xf32>
    %c0_40 = arith.constant 0 : index
    %c0_41 = arith.constant 0 : index
    %39 = vector.load %arg13[%c0_40, %c0_41] : memref<8x128xf32, #tpu.memory_space<vmem>>, vector<8x128xf32>
    tpu.vector_store %arg13[%c0_40, %c0_41], %38 {strides = array<i32>} : memref<8x128xf32, #tpu.memory_space<vmem>>, vector<8x128xf32>,
    %cst_42 = arith.constant 0.000000e+00 : f32
    %40 = vector.broadcast %cst_42 : f32 to vector<8x2xf32>
    %c0_43 = arith.constant 0 : index
    %c0_44 = arith.constant 0 : index
    %41 = vector.load %arg14[%c0_43, %c0_44] : memref<16x128xf32, #tpu.memory_space<vmem>>, vector<8x2xf32>
    tpu.vector_store %arg14[%c0_43, %c0_44], %40 {strides = array<i32>} : memref<16x128xf32, #tpu.memory_space<vmem>>, vector<8x2xf32>,
    %c0_45 = arith.constant 0 : index
    %c0_46 = arith.constant 0 : index
    %42 = vector.load %arg13[%c0_45, %c0_46] : memref<8x128xf32, #tpu.memory_space<vmem>>, vector<8x126xf32>
    %c0_47 = arith.constant 0 : index
    %c2 = arith.constant 2 : index
    %43 = vector.load %arg14[%c0_47, %c2] : memref<16x128xf32, #tpu.memory_space<vmem>>, vector<8x126xf32>
    tpu.vector_store %arg14[%c0_47, %c2], %42 {strides = array<i32>} : memref<16x128xf32, #tpu.memory_space<vmem>>, vector<8x126xf32>,
    %c0_48 = arith.constant 0 : index
    %c0_49 = arith.constant 0 : index
    %44 = vector.load %arg13[%c0_48, %c0_49] : memref<8x128xf32, #tpu.memory_space<vmem>>, vector<8x128xf32>
    %c8_50 = arith.constant 8 : index
    %c0_51 = arith.constant 0 : index
    %45 = vector.load %arg14[%c8_50, %c0_51] : memref<16x128xf32, #tpu.memory_space<vmem>>, vector<8x128xf32>
    tpu.vector_store %arg14[%c8_50, %c0_51], %44 {strides = array<i32>} : memref<16x128xf32, #tpu.memory_space<vmem>>, vector<8x128xf32>,
    %c0_52 = arith.constant 0 : index
    %c0_53 = arith.constant 0 : index
    %46 = vector.load %arg8[%c0_52, %c0_53] : memref<8x16xf32, #tpu.memory_space<vmem>>, vector<8x16xf32>
    %c0_54 = arith.constant 0 : index
    %c0_55 = arith.constant 0 : index
    %47 = vector.load %arg14[%c0_54, %c0_55] : memref<16x128xf32, #tpu.memory_space<vmem>>, vector<16x128xf32>
    %cst_56 = arith.constant dense<0.000000e+00> : vector<8x128xf32>
    %48 = tpu.matmul %46, %47, %cst_56 {dimension_numbers = #tpu.dot_dimension_numbers<[1], [0], [0], [1], [0, 0, 1, 1], [], []>} : vector<8x16xf32>, vector<16x128xf32>, vector<8x128xf32> -> vector<8x128xf32>
    %c0_57 = arith.constant 0 : index
    %c0_58 = arith.constant 0 : index
    %49 = vector.load %arg9[%c0_57, %c0_58] : memref<8x1xf32, #tpu.memory_space<vmem>>, vector<8x1xf32>
    %50 = vector.broadcast %49 : vector<8x1xf32> to vector<8x128xf32>
    %51 = arith.addf %48, %50 : vector<8x128xf32>
    %cst_59 = arith.constant 0.000000e+00 : f32
    %52 = vector.broadcast %cst_59 : f32 to vector<8x128xf32>
    %53 = arith.maximumf %51, %52 : vector<8x128xf32>
    %cst_60 = arith.constant 0.000000e+00 : f32
    %54 = vector.broadcast %cst_60 : f32 to vector<8x2xf32>
    %c0_61 = arith.constant 0 : index
    %c0_62 = arith.constant 0 : index
    %55 = vector.load %arg14[%c0_61, %c0_62] : memref<16x128xf32, #tpu.memory_space<vmem>>, vector<8x2xf32>
    tpu.vector_store %arg14[%c0_61, %c0_62], %54 {strides = array<i32>} : memref<16x128xf32, #tpu.memory_space<vmem>>, vector<8x2xf32>,
    %56 = vector.extract_strided_slice %53 {offsets = [0, 0], sizes = [8, 126], strides = [1, 1]} : vector<8x128xf32> to vector<8x126xf32>
    %c0_63 = arith.constant 0 : index
    %c2_64 = arith.constant 2 : index
    %57 = vector.load %arg14[%c0_63, %c2_64] : memref<16x128xf32, #tpu.memory_space<vmem>>, vector<8x126xf32>
    tpu.vector_store %arg14[%c0_63, %c2_64], %56 {strides = array<i32>} : memref<16x128xf32, #tpu.memory_space<vmem>>, vector<8x126xf32>,
    %c8_65 = arith.constant 8 : index
    %c0_66 = arith.constant 0 : index
    %58 = vector.load %arg14[%c8_65, %c0_66] : memref<16x128xf32, #tpu.memory_space<vmem>>, vector<8x128xf32>
    tpu.vector_store %arg14[%c8_65, %c0_66], %53 {strides = array<i32>} : memref<16x128xf32, #tpu.memory_space<vmem>>, vector<8x128xf32>,
    %c0_67 = arith.constant 0 : index
    %c0_68 = arith.constant 0 : index
    %59 = vector.load %arg10[%c0_67, %c0_68] : memref<8x16xf32, #tpu.memory_space<vmem>>, vector<8x16xf32>
    %c0_69 = arith.constant 0 : index
    %c0_70 = arith.constant 0 : index
    %60 = vector.load %arg14[%c0_69, %c0_70] : memref<16x128xf32, #tpu.memory_space<vmem>>, vector<16x128xf32>
    %cst_71 = arith.constant dense<0.000000e+00> : vector<8x128xf32>
    %61 = tpu.matmul %59, %60, %cst_71 {dimension_numbers = #tpu.dot_dimension_numbers<[1], [0], [0], [1], [0, 0, 1, 1], [], []>} : vector<8x16xf32>, vector<16x128xf32>, vector<8x128xf32> -> vector<8x128xf32>
    %c0_72 = arith.constant 0 : index
    %c0_73 = arith.constant 0 : index
    %62 = vector.load %arg11[%c0_72, %c0_73] : memref<8x1xf32, #tpu.memory_space<vmem>>, vector<8x1xf32>
    %63 = vector.broadcast %62 : vector<8x1xf32> to vector<8x128xf32>
    %64 = arith.addf %61, %63 : vector<8x128xf32>
    %cst_74 = arith.constant 0.000000e+00 : f32
    %65 = vector.broadcast %cst_74 : f32 to vector<8x128xf32>
    %66 = arith.maximumf %64, %65 : vector<8x128xf32>
    %c0_75 = arith.constant 0 : index
    %c0_76 = arith.constant 0 : index
    %67 = vector.load %arg13[%c0_75, %c0_76] : memref<8x128xf32, #tpu.memory_space<vmem>>, vector<8x128xf32>
    %68 = arith.addf %66, %67 : vector<8x128xf32>
    %cst_77 = arith.constant 0.000000e+00 : f32
    %69 = vector.broadcast %cst_77 : f32 to vector<8x128xf32>
    %70 = arith.maximumf %68, %69 : vector<8x128xf32>
    %c0_78 = arith.constant 0 : index
    %c0_79 = arith.constant 0 : index
    %c0_80 = arith.constant 0 : index
    %71 = vector.load %arg12[%c0_78, %c0_79, %c0_80] : memref<1x8x128xf32, #tpu.memory_space<vmem>>, vector<1x8x128xf32>
    %72 = vector.shape_cast %71 : vector<1x8x128xf32> to vector<8x128xf32>
    %73 = vector.shape_cast %70 : vector<8x128xf32> to vector<1x8x128xf32>
    tpu.vector_store %arg12[%c0_78, %c0_79, %c0_80], %73 {strides = array<i32>} : memref<1x8x128xf32, #tpu.memory_space<vmem>>, vector<1x8x128xf32>,
    return
  }
  func.func @transform_0(%arg0: i32) -> (i32, i32, i32) {
    %c0_i32 = arith.constant 0 : i32
    %c0_i32_0 = arith.constant 0 : i32
    %c0_i32_1 = arith.constant 0 : i32
    return %arg0, %c0_i32, %c0_i32_0 : i32, i32, i32
  }
  func.func @transform_1(%arg0: i32) -> (i32, i32) {
    %c0_i32 = arith.constant 0 : i32
    %c0_i32_0 = arith.constant 0 : i32
    %c0_i32_1 = arith.constant 0 : i32
    return %c0_i32, %c0_i32_0 : i32, i32
  }
  func.func @transform_2(%arg0: i32) -> (i32, i32) {
    %c0_i32 = arith.constant 0 : i32
    %c0_i32_0 = arith.constant 0 : i32
    %c0_i32_1 = arith.constant 0 : i32
    return %c0_i32, %c0_i32_0 : i32, i32
  }
  func.func @transform_3(%arg0: i32) -> (i32, i32) {
    %c0_i32 = arith.constant 0 : i32
    %c0_i32_0 = arith.constant 0 : i32
    %c0_i32_1 = arith.constant 0 : i32
    return %c0_i32, %c0_i32_0 : i32, i32
  }
  func.func @transform_4(%arg0: i32) -> (i32, i32) {
    %c0_i32 = arith.constant 0 : i32
    %c0_i32_0 = arith.constant 0 : i32
    %c0_i32_1 = arith.constant 0 : i32
    return %c0_i32, %c0_i32_0 : i32, i32
  }
  func.func @transform_5(%arg0: i32) -> (i32, i32) {
    %c0_i32 = arith.constant 0 : i32
    %c0_i32_0 = arith.constant 0 : i32
    %c0_i32_1 = arith.constant 0 : i32
    return %c0_i32, %c0_i32_0 : i32, i32
  }
  func.func @transform_6(%arg0: i32) -> (i32, i32) {
    %c0_i32 = arith.constant 0 : i32
    %c0_i32_0 = arith.constant 0 : i32
    %c0_i32_1 = arith.constant 0 : i32
    return %c0_i32, %c0_i32_0 : i32, i32
  }
  func.func @transform_7(%arg0: i32) -> (i32, i32) {
    %c0_i32 = arith.constant 0 : i32
    %c0_i32_0 = arith.constant 0 : i32
    %c0_i32_1 = arith.constant 0 : i32
    return %c0_i32, %c0_i32_0 : i32, i32
  }
  func.func @transform_8(%arg0: i32) -> (i32, i32) {
    %c0_i32 = arith.constant 0 : i32
    %c0_i32_0 = arith.constant 0 : i32
    %c0_i32_1 = arith.constant 0 : i32
    return %c0_i32, %c0_i32_0 : i32, i32
  }
  func.func @transform_9(%arg0: i32) -> (i32, i32) {
    %c0_i32 = arith.constant 0 : i32
    %c0_i32_0 = arith.constant 0 : i32
    %c0_i32_1 = arith.constant 0 : i32
    return %c0_i32, %c0_i32_0 : i32, i32
  }
  func.func @transform_10(%arg0: i32) -> (i32, i32) {
    %c0_i32 = arith.constant 0 : i32
    %c0_i32_0 = arith.constant 0 : i32
    %c0_i32_1 = arith.constant 0 : i32
    return %c0_i32, %c0_i32_0 : i32, i32
  }
  func.func @transform_11(%arg0: i32) -> (i32, i32, i32) {
    %c0_i32 = arith.constant 0 : i32
    %c0_i32_0 = arith.constant 0 : i32
    %c0_i32_1 = arith.constant 0 : i32
    return %arg0, %c0_i32, %c0_i32_0 : i32, i32, i32
  }
}

</mosaic_0001>

<bundles_post_ra>
// kernel: tpu_custom_call.1
= control target key start
LH: loop header
LB: loop body
LE: loop exit
PB: predicated region body
PF: predicated region fallthrough
CT: control target
= control target key end

     0   :  { %s1299_s0 = inlined_call_operand.vmem [shape: f32[2,4,128], index: 0, kind: input, shape index: {}]   ;;  %s1300_s1 = inlined_call_operand.vmem [shape: f32[8,8], index: 1, kind: input, shape index: {}]   ;;  %s1301_s2 = inlined_call_operand.vmem [shape: f32[8,1], index: 2, kind: input, shape index: {}]   ;;  %s1302_s3 = inlined_call_operand.vmem [shape: f32[8,16], index: 3, kind: input, shape index: {}]   ;;  %s1303_s4 = inlined_call_operand.vmem [shape: f32[8,1], index: 4, kind: input, shape index: {}]   ;;  %s1304_s5 = inlined_call_operand.vmem [shape: f32[8,4], index: 5, kind: input, shape index: {}]   ;;  %s1305_s6 = inlined_call_operand.vmem [shape: f32[8,1], index: 6, kind: input, shape index: {}]   ;;  %s1306_s7 = inlined_call_operand.vmem [shape: f32[8,16], index: 7, kind: input, shape index: {}]   ;;  %s1307_s8 = inlined_call_operand.vmem [shape: f32[8,1], index: 8, kind: input, shape index: {}]   ;;  %s1308_s9 = inlined_call_operand.vmem [shape: f32[8,16], index: 9, kind: input, shape index: {}]   ;;  %s1309_s10 = inlined_call_operand.vmem [shape: f32[8,1], index: 10, kind: input, shape index: {}]   ;;  %s1310_s11 = inlined_call_operand.hbm [shape: f32[2,8,128], index: 11, kind: output, shape index: {}]  }
   0x1   :  { %1311 = sst [smem:[#allocation7_spill]] %s1299_s0 }
   0x2   :  { %1312 = sst [smem:[#allocation8_spill]] %s1300_s1 }
   0x3   :  { %16 = vsyncpa [#allocation5], 0 }
   0x4   :  { %18 = vsyncpa [#allocation5 + $0x1], 0  ;;  %s1153_s17 = smov 0   ;;  %s1155_s18 = smov 0  }
   0x5   :  { %s1157_s19 = smov 0   ;;  %s1159_s20 = smov 0  }
   0x6 LB: > { %s1174_s21 = sadd.s32 4294967295, %s1085_s20   ;;  %s919_s22 = sadd.s32 4294967294, %s1085_s20   ;;  %s1085_s20 = sphi %s1159_s20, %s1320_s20   ;;  %s1081_s19 = sphi %s1157_s19, %s1319_s19   ;;  %s1077_s18 = sphi %s1155_s18, %s1318_s18   ;;  %s1073_s17 = sphi %s1153_s17, %s1317_s17  }
   0x7   : > { %s1178_s23 = sadd.s32 1, %s1085_s20   ;;  %s267_s24 = sadd.s32 1, %s1081_s19 }
   0x8   : > { %s264_s25 = ssub.s32 %s1085_s20, %s1178_s23  ;;  %p277_p0 = scmp.ne.s32.totalorder %s1081_s19, %s1077_s18 }
   0x9   : > { %p265_p1 = scmp.eq.s32.totalorder %s264_s25, 0  ;;  %p278_p2 = scmp.eq.s32.totalorder %s1174_s21, 1 }
   0xa   : > { %p283_p3 = scmp.ne.s32.totalorder %s1077_s18, %s1073_s17  ;;  %p284_p4 = scmp.eq.s32.totalorder %s919_s22, 1 }
   0xb   : > { %s1189_s26 = scalar_select %p265_p1, %s1081_s19, %s267_s24  }
   0xc   : > { %p1191_p5 = por %p278_p2, %p277_p0  ;;  %p1195_p6 = por %p284_p4, %p283_p3 }
   0xd   : > { %p922_p7 = scmp.ge.s32.totalorder %s1085_s20, 1  ;;  %p339_p8 = scmp.lt.s32.totalorder %s1085_s20, 3 }
   0xf   : > { %p340_p9 = pnand %p922_p7, %p339_p8 }
  0x10   : > { %p378_p10 = scmp.lt.s32.totalorder (!%p340_p9), %s1174_s21, 1  ;;  %s1315_s0 = sld [smem:[#allocation7_spill]] (!%p340_p9) }
  0x11   : > { %343 = sbr.rel (%p340_p9) target bundleno = 1332 (0x534), region = 64  ;;  %s1090_s15 = smov (!%p340_p9), 1  }
  0x12   : > { %s1316_s1 = sld [smem:[#allocation8_spill]] (!%p340_p9)  ;;  %s1091_s12 = smov (!%p340_p9), 2  }
  0x13   : > { %s375_s24 = sand.u32 (!%p340_p9), 1, %s1077_s18  }
  0x14   : > { %s923_s25 = sshll.u32 (!%p340_p9), %s375_s24, 3  ;;  %s847_s16 = scalar_lea.sflag (!%p340_p9), [#allocation5], %s375_s24 }
  0x16   : > { %vm382_vm0 = vcmask 3072   ;;  %v1087_v0 = vmov 0.0   ;;  %s379_s29 = scalar_select %p378_p10, %s1174_s21, 1  ;;  %vm1088_vm1 = vmmov 0   ;;  %v1089_v1 = vmov 0   ;;  %v395_v4 = vld [vmem:[%s1301_s2] sm:$0xff] }
  0x17   : > { %383 = vst.msk [vmem:[#allocation3] sm:$0xf] %vm382_vm0, %v1087_v0  ;;  %948 = vmatprep.subr.mxu0 %v1087_v0  ;;  %953 = vmatprep.subr.mxu1 %v1087_v0  ;;  %vm389_vm2 = vcmask 1043464   ;;  %vm401_vm3 = vcmask 64512   ;;  %vm476_vm4 = vcmask 7168   ;;  %vm581_vm5 = vcmask 1043456  }
  0x18   : > { %950 = vmatprep.mubr.msk.f32.mxu0 %vm1088_vm1, %v1087_v0  ;;  %957 = vmatprep.mubr.msk.f32.mxu1 %vm1088_vm1, %v1087_v0  ;;  %s924_s30 = sshll.u32 %s379_s29, 2  ;;  %v393_v6 = vld [vmem:[%s1316_s1] sm:$0xff]  ;;  %vm577_vm6 = vcmask 31744   ;;  %vm482_vm7 = vcmask 1047560   ;;  %vm494_vm8 = vcmask 130048   ;;  %vm658_vm9 = vcmask 15360  }
  0x19   : > { %1023 = vset.pattern.permute.xlu0 %v1089_v1  ;;  %1024 = vset.pattern.permute.xlu1 %v1089_v1  ;;  %s381_s14 = scalar_lea.vmem %s1315_s0, %s924_s30  ;;  %v570_v9 = vld [vmem:[%s1304_s5] sm:$0xff]  ;;  %vm665_vm10 = vcmask 1047568   ;;  %s377_s29 = scalar_lea.vmem [#allocation4], %s923_s25 }
  0x1a   : > { %v384_v2 = vld [vmem:[%s381_s14] sm:$0xf]  ;;  %s860_s30 = sshll.u32 %s377_s29, 4  ;;  %s1092_s0 = smov [#allocation4]   ;;  %s861_s30 = int_to_ptr.vmem [resolvable:$true] %s860_s30 }
  0x1b   : > { %v391_v3 = vld [vmem:[%s381_s14] sm:$0xf]  ;;  %386 = vrot.lane.b32.xlu0 %v384_v2, %s1090_s15  ;;  %s1025_s22 = scalar_lea.vmem %s861_s30, 128  ;;  %s1029_s1 = sshll.u32 %s1092_s0, 4  ;;  %s1030_s1 = int_to_ptr.vmem [resolvable:$false] %s1029_s1 }
  0x1c   : > { %392 = vst [vmem:[#allocation3 + $0x4] sm:$0xf] %v391_v3  ;;  %v569_v8 = vld [vmem:[%s381_s14] sm:$0xf]  ;;  %p1026_p11 = scmp.ne.s32.totalorder %s861_s30, %s1025_s22  ;;  %p1032_p0 = scmp.lt.s32.totalorder %s861_s30, %s1030_s1 }
  0x1d   : > { %v488_v15 = vld [vmem:[%s1303_s4] sm:$0xff] }
  0x1e   : > { %v571_v16 = vld [vmem:[%s1305_s6] sm:$0xff]  ;;  %p1027_p12 = pnand %p1026_p11, %p1191_p5 }
  0x1f   : > { %398 = vperm.xlu0 %1023, %v395_v4   ;;  %v672_v17 = vld [vmem:[%s1307_s8] sm:$0xff] }
  0x20   : > { %v762_v18 = vld [vmem:[%s1309_s10] sm:$0xff]  ;;  %p1028_p13 = pneg %p1027_p12 }
  0x21   : > { %v485_v20 = vld [vmem:[%s1302_s3] sm:$0xff] }
  0x22   : > { %v669_v34 = vld [vmem:[%s1306_s7] sm:$0xff] }
  0x23   : > { %v759_v42 = vld [vmem:[%s1308_s9] sm:$0xff] }
  0x8d   : > { %v387_v5 = vpop.permute.xlu0 %386 }
  0x8e   : > { %390 = vst.msk [vmem:[#allocation3] sm:$0xf] %vm389_vm2, %v387_v5 }
  0x95   : > { %v394_v7 = vld [vmem:[#allocation3] sm:$0xff] }
  0x96   : > { %949 = vmatpush3.msra.mxu0 %v394_v7  ;;  %477 = vst.msk [vmem:[#allocation3] sm:$0xff] %vm476_vm4, %v1087_v0 }
  0x97   : > { %951 = vmatmul.mubr.msk.f32.vlgmr.msra.gmra.mxu0 %vm401_vm3, %v393_v6  ;;  %960 = vmatprep.subr.mxu0 %v1087_v0 }
  0x98   : > { %962 = vmatprep.mubr.msk.f32.mxu0 %vm1088_vm1, %v1087_v0  ;;  %961 = vmatpush3.msk.msra.mxu0 %vm581_vm5, %v569_v8 }
  0x99   : > { %972 = vmatprep.subr.mxu0 %v1087_v0 }
  0x9a   : > { %v399_v10 = vpop.permute.xlu0 %398 }
  0x9b   : > { %963 = vmatmul.mubr.msk.f32.vlgmr.msra.gmra.mxu0 %vm577_vm6, %v570_v9 }
  0x9c   : > { %976 = vmatprep.mubr.msk.f32.mxu0 %vm1088_vm1, %v1087_v0 }
 0x157   : > { %v471_v11 = vpop.f32.mrf.mxu0 }
 0x158   : > { %v472_v12 = vadd.f32 %v471_v11, %v399_v10 }
 0x159   : > { %v952_v13 = vpop.f32.mrf.mxu0 }
 0x15a   : > { %v475_v14 = vmax.f32 %v472_v12, 0.0 }
 0x15b   : > { %v651_v22 = vpop.f32.mrf.mxu0 }
 0x15c   : > { %479 = vrot.lane.b32.xlu1 %v475_v14, %s1090_s15  ;;  %954 = vmatpush3.msra.mxu1 %v475_v14  ;;  %s932_s15 = sshll.u32 %s1174_s21, 7  ;;  %s1031_s21 = scalar_lea.vmem %s1030_s1, 256 }
 0x15d   : > { %955 = vmatprep.subr.mxu1 %v1087_v0  ;;  %v964_v23 = vpop.f32.mrf.mxu0  ;;  %s858_s14 = scalar_lea.hbm %s1310_s11, %s932_s15  ;;  %p1033_p1 = scmp.lt.s32.totalorder %s1031_s21, %s1025_s22 }
 0x15f   : > { %p1034_p2 = por %p1033_p1, %p1032_p0 }
 0x160   : > { %491 = vperm.xlu1 %1024, %v488_v15  }
 0x161   : > { %p1035_p3 = pnand %p1034_p2, %p1028_p13 }
 0x164   : > { %574 = vperm.xlu1 %1024, %v571_v16  }
 0x168   : > { %675 = vperm.xlu1 %1024, %v672_v17  }
 0x16c   : > { %765 = vperm.xlu1 %1024, %v762_v18  }
 0x1ce   : > { %v480_v19 = vpop.permute.xlu1 %479 }
 0x1cf   : > { %483 = vst.msk [vmem:[#allocation3] sm:$0xff] %vm482_vm7, %v480_v19 }
 0x1d6   : > { %v486_v21 = vld [vmem:[#allocation3] sm:$0xff] }
 0x1d7   : > { %956 = vmatpush3.msra.mxu1 %v486_v21  ;;  %659 = vst.msk [vmem:[#allocation3] sm:$0xff] %vm658_vm9, %v1087_v0 }
 0x1d8   : > { %958 = vmatmul.mubr.msk.f32.vlgmr.msra.gmra.mxu1 %vm494_vm8, %v485_v20  ;;  %965 = vmatprep.subr.mxu1 %v1087_v0 }
 0x1d9   : > { %969 = vmatprep.mubr.msk.f32.mxu1 %vm1088_vm1, %v1087_v0 }
 0x1db   : > { %v492_v24 = vpop.permute.xlu1 %491 }
 0x1df   : > { %v575_v27 = vpop.permute.xlu1 %574 }
 0x1e0   : > { %v652_v29 = vadd.f32 %v651_v22, %v575_v27 }
 0x1e3   : > { %v676_v36 = vpop.permute.xlu1 %675 }
 0x1e7   : > { %v766_v44 = vpop.permute.xlu1 %765 }
 0x298   : > { %v564_v25 = vpop.f32.mrf.mxu1 }
 0x299   : > { %v565_v26 = vadd.f32 %v564_v25, %v492_v24 }
 0x29a   : > { %v959_v28 = vpop.f32.mrf.mxu1 }
 0x29b   : > { %v568_v30 = vmax.f32 %v565_v26, 0.0 }
 0x29d   : > { %v655_v31 = vadd.f32 %v652_v29, %v568_v30 }
 0x29f   : > { %v656_v32 = vmax.f32 %v655_v31, 0.0 }
 0x2a1   : > { %662 = vrot.lane.b32.xlu0 %v656_v32, %s1091_s12  ;;  %966 = vmatpush3.msra.mxu1 %v656_v32 }
 0x2a2   : > { %967 = vmatprep.subr.mxu1 %v1087_v0 }
 0x313   : > { %v663_v33 = vpop.permute.xlu0 %662 }
 0x314   : > { %666 = vst.msk [vmem:[#allocation3] sm:$0xff] %vm665_vm10, %v663_v33 }
 0x31b   : > { %v670_v35 = vld [vmem:[#allocation3] sm:$0xff] }
 0x31c   : > { %968 = vmatpush3.msra.mxu1 %v670_v35  ;;  %752 = vst.msk [vmem:[#allocation3] sm:$0xff] %vm658_vm9, %v1087_v0 }
 0x31d   : > { %970 = vmatmul.mubr.msk.f32.vlgmr.msra.gmra.mxu1 %vm494_vm8, %v669_v34 }
 0x3dd   : > { %v747_v37 = vpop.f32.mrf.mxu1 }
 0x3de   : > { %v748_v38 = vadd.f32 %v747_v37, %v676_v36 }
 0x3df   : > { %v971_v39 = vpop.f32.mrf.mxu1 }
 0x3e0   : > { %v751_v40 = vmax.f32 %v748_v38, 0.0 }
 0x3e2   : > { %754 = vrot.lane.b32.xlu0 %v751_v40, %s1091_s12  ;;  %973 = vmatpush3.msra.mxu0 %v751_v40 }
 0x3e3   : > { %974 = vmatprep.subr.mxu0 %v1087_v0 }
 0x454   : > { %v755_v41 = vpop.permute.xlu0 %754 }
 0x455   : > { %757 = vst.msk [vmem:[#allocation3] sm:$0xff] %vm665_vm10, %v755_v41 }
 0x45c   : > { %v760_v43 = vld [vmem:[#allocation3] sm:$0xff] }
 0x45d   : > { %975 = vmatpush3.msra.mxu0 %v760_v43 }
 0x45e   : > { %977 = vmatmul.mubr.msk.f32.vlgmr.msra.gmra.mxu0 %vm494_vm8, %v759_v42 }
 0x51e   : > { %v837_v45 = vpop.f32.mrf.mxu0 }
 0x51f   : > { %v838_v46 = vadd.f32 %v837_v45, %v766_v44 }
 0x520   : > { %v978_v47 = vpop.f32.mrf.mxu0 }
 0x521   : > { %v841_v48 = vmax.f32 %v838_v46, 0.0 }
 0x523   : > { %v843_v49 = vadd.f32 %v841_v48, %v656_v32 }
 0x525   : > { %v844_v50 = vmax.f32 %v843_v49, 0.0 }
 0x527   : > { %845 = vst [vmem:[%s377_s29] sm:$0xff] %v844_v50 }
 0x528   : > { %1038 = shalt.err (!%p1035_p3)
}
 0x529   : > { %s1039_s25 = scalar_lea.hbm %s858_s14, 128  ;;  %s1043_s29 = scalar_lea.hbm %s1310_s11, 256 }
 0x52a   : > { %p1040_p4 = scmp.ne.s32.totalorder %s858_s14, %s1039_s25  ;;  %p1044_p9 = scmp.lt.s32.totalorder %s858_s14, %s1310_s11 }
 0x52b   : > { %p1045_p10 = scmp.lt.s32.totalorder %s1043_s29, %s1039_s25 }
 0x52c   : > { %p1041_p7 = pnand %p1040_p4, %p1191_p5 }
 0x52d   : > { %p1046_p11 = por %p1045_p10, %p1044_p9 }
 0x52e   : > { %p1042_p8 = pneg %p1041_p7 }
 0x530   : > { %p1047_p12 = pnand %p1046_p11, %p1042_p8 }
 0x532   : > { %1050 = shalt.err (!%p1047_p12)
}
 0x533   : > { %979 = dma.vmem_to_hbm [thread:$0]  (%p1191_p5), %s861_s30, 128, %s858_s14, %s847_s16  }
 0x534 PF: > { %p985_p13 = scmp.ge.s32.totalorder %s1085_s20, 2  ;;  %s872_s0 = sand.u32 1, %s1073_s17  }
 0x535   : > { %s873_s1 = scalar_lea.sflag [#allocation5], %s872_s0 }
 0x536   : > { %p982_p0 = pnand %p985_p13, %p1195_p6 }
 0x538   : > { %p983_p1 = pneg %p982_p0 }
 0x53a   : > { %1068 = dma.done.wait (%p983_p1), %s873_s1, 128  }
 0x53b   : > { %1070 = vsyncadd (%p983_p1), %s873_s1, 4294967168  ;;  %p21_p2 = scmp.ge.s32.totalorder %s1178_s23, 4   ;;  %s1317_s17 = smov %s1077_s18 }
 0x53c   : > { %s1318_s18 = smov %s1081_s19  ;;  %s1319_s19 = smov %s1189_s26 }
 0x53d   : > { %s1320_s20 = smov %s1178_s23  ;;  %23 = sbr.rel (!%p21_p2) target bundleno = 6 (0x6), region = 99 }
 0x542   :  { %878 = vsyncpa [#allocation5], 1 }
 0x543   :  { %880 = vsyncpa [#allocation5 + $0x1], 1 }

</bundles_post_ra>
